<compile_context>
chip_gen: v5e
topology: v5e:2x2
jax: 0.10.0
libtpu: 0.0.40
codegen_flags: <defaults>
</compile_context>

<pallas_src>
import math
import warnings

import jax
import jax.numpy as jnp
from jax.experimental import pallas as pl
from jax.experimental.pallas import tpu as pltpu


def _cdiv(a: int, b: int) -> int:
    return -(-a // b)


def _vmem_capacity_bytes() -> int:
    """Per-core VMEM capacity; conservative fallback if the query is unavailable."""
    try:
        return int(pltpu.get_tpu_info().vmem_capacity_bytes)
    except Exception:
        return 64 << 20  # v7x per-TensorCore VMEM (smallest of the fleet)


# ----------------------------------------------------------------------------
# Standalone channel_selection2 (elementwise scale, mem-bound)
# ----------------------------------------------------------------------------
def _channel_selection_kernel(x_ref, idx_ref, o_ref):
    # x_ref / o_ref: (TILE_ROWS, D) lane-dense slab
    # idx_ref:       (1, D) channel-selection row, resident across the grid
    o_ref[...] = x_ref[...] * idx_ref[...]  # (1, D) broadcasts over rows (VPU)


def _pick_tile_rows(rows: int, row_bytes: int, sublane: int, vmem_cap: int) -> int:
    """Largest row tile that fits the pipeline VMEM budget; full-extent if possible."""
    if rows <= sublane:
        return rows
    # BlockSpec double-buffers input and output tiles -> ~4x block bytes live.
    pipeline_budget = min(vmem_cap // 2, 64 << 20)
    block_target = max(1 << 20, pipeline_budget // 4)  # v7x: ~8 MiB, v5e/v6e: ~16 MiB
    tr = min(rows, max(sublane, block_target // max(row_bytes, 1)))
    if tr >= rows:
        return rows  # single full-extent block, zero per-step overhead
    tr = max(sublane, (tr // sublane) * sublane)
    steps = _cdiv(rows, tr)
    # Multi-step grids: keep the step count even so the "parallel" axis
    # load-balances across v7x's two TensorCores (no-op on v5e/v6e, where the
    # grid is just a loop and fewer/larger steps is strictly better).
    if steps > 1 and steps % 2 == 1:
        steps += 1
        tr = max(sublane, _cdiv(_cdiv(rows, steps), sublane) * sublane)
    return tr


def channel_selection2(x, indexes, *, donate_input: bool = False):
    """Forward of channel_selection2: x * indexes (broadcast over channel dim).

    x: (..., D) array; indexes: (D,) array. Set donate_input=True only when the
    unscaled activation is not reused downstream (aliases the output buffer).
    """
    *lead, D = x.shape
    rows = math.prod(lead) if lead else 1

    # Match torch type promotion for the multiply (e.g. bf16 * f32 -> f32).
    out_dtype = jnp.promote_types(x.dtype, indexes.dtype)
    itemsize = jnp.dtype(out_dtype).itemsize
    sublane = max(8, 32 // itemsize)  # f32: 8, bf16: 16, int8/fp8: 32

    x2d = x.reshape(rows, D).astype(out_dtype)
    idx_row = indexes.reshape(1, D).astype(out_dtype)

    # Narrow-channel lane packing: fold k = 128 // D rows into one lane-dense
    # row so the output last dim is a multiple of 128 (unmasked vst).
    rows_eff, d_eff = rows, D
    if D < 128 and 128 % D == 0:
        k = 128 // D
        if rows >= k and rows % k == 0:
            rows_eff = rows // k
            d_eff = k * D
            x2d = x2d.reshape(rows_eff, d_eff)
            idx_row = jnp.tile(idx_row, (1, k))

    vmem_cap = _vmem_capacity_bytes()
    tile_rows = _pick_tile_rows(rows_eff, d_eff * itemsize, sublane, vmem_cap)
    grid = (_cdiv(rows_eff, tile_rows),)

    block_bytes = tile_rows * d_eff * itemsize
    vmem_limit = int(
        min(vmem_cap, max(32 << 20, 4 * block_bytes + 2 * d_eff * itemsize + (4 << 20)))
    )

    out2d = pl.pallas_call(
        _channel_selection_kernel,
        out_shape=jax.ShapeDtypeStruct((rows_eff, d_eff), out_dtype),
        grid_spec=pltpu.PrefetchScalarGridSpec(
            num_scalar_prefetch=0,
            grid=grid,
            in_specs=[
                # lane-dense activation slab, tiled over rows
                pl.BlockSpec((tile_rows, d_eff), lambda i: (i, 0)),
                # constant index_map -> fetched once, stays resident in VMEM
                pl.BlockSpec((1, d_eff), lambda i: (0, 0)),
            ],
            out_specs=pl.BlockSpec((tile_rows, d_eff), lambda i: (i, 0)),
        ),
        compiler_params=pltpu.CompilerParams(
            dimension_semantics=("parallel",),
            vmem_limit_bytes=vmem_limit,
        ),
        cost_estimate=pl.CostEstimate(
            flops=rows * D,
            transcendentals=0,
            bytes_accessed=(2 * rows * D + D) * itemsize,
        ),
        input_output_aliases=({0: 0} if donate_input else {}),
    )(x2d, idx_row)

    return out2d.reshape(x.shape)


# ----------------------------------------------------------------------------
# Fused Linear (bias-free) + channel_selection2 — how select1/select2 should be
# integrated in ViT11: apply the channel scale in the matmul epilogue and skip
# the standalone HBM round trip entirely.
# ----------------------------------------------------------------------------
def _linear_select_kernel(x_ref, w_ref, idx_ref, o_ref):
    acc = jnp.dot(x_ref[...], w_ref[...], preferred_element_type=jnp.float32)
    o_ref[...] = (acc * idx_ref[...]).astype(o_ref.dtype)


def linear_channel_selection(x, w, indexes):
    """Fused `channel_selection2(Linear(bias=False)(x))` = (x @ w) * indexes.

    x: (..., K); w: (K, N) (torch weight transposed); indexes: (N,).
    """
    *lead, K = x.shape
    Kw, N = w.shape
    assert Kw == K, "weight/in-feature mismatch"
    rows = math.prod(lead) if lead else 1

    x2d = x.reshape(rows, K)
    idx_row = indexes.reshape(1, N).astype(jnp.float32)
    out_dtype = x.dtype
    itemsize = jnp.dtype(out_dtype).itemsize

    tm = rows if rows <= 512 else 512
    tn = N if (N % 128 != 0 or N <= 1024) else 1024
    grid = (_cdiv(rows, tm), _cdiv(N, tn))
    # TODO(synk): tile the contraction (K) with an f32 VMEM accumulator for K
    # too large to hold a full (tm, K) / (K, tn) pair in VMEM (K <= 1536 in ViT11).

    out2d = pl.pallas_call(
        _linear_select_kernel,
        out_shape=jax.ShapeDtypeStruct((rows, N), out_dtype),
        grid_spec=pltpu.PrefetchScalarGridSpec(
            num_scalar_prefetch=0,
            grid=grid,
            in_specs=[
                pl.BlockSpec((tm, K), lambda i, j: (i, 0)),
                pl.BlockSpec((K, tn), lambda i, j: (0, j)),
                pl.BlockSpec((1, tn), lambda i, j: (0, j)),
            ],
            out_specs=pl.BlockSpec((tm, tn), lambda i, j: (i, j)),
        ),
        compiler_params=pltpu.CompilerParams(
            dimension_semantics=("parallel", "parallel"),
        ),
        cost_estimate=pl.CostEstimate(
            flops=2 * rows * N * K,
            transcendentals=0,
            bytes_accessed=(rows * K + K * N + N + rows * N) * itemsize,
        ),
    )(x2d, w, idx_row)

    return out2d.reshape(tuple(lead) + (N,))


if __name__ == "__main__":
    key = jax.random.PRNGKey(0)
    kx, ki, kw, kx2, ki2, kx3 = jax.random.split(key, 6)

    # Shapes implied by ViT11 defaults: hidden=384, patch=8 -> 8*8 + 1 = 65 tokens.
    B, N, D = 2, 65, 384
    x = jax.random.normal(kx, (B, N, D), dtype=jnp.float32)

    # Module init is torch.ones(num_channels); perturb so the multiply is exercised.
    indexes = jnp.ones((D,), jnp.float32) + 0.1 * jax.random.normal(ki, (D,), jnp.float32)
    # grads / hessian_diagonal are buffers that are unused in forward.

    out = jax.block_until_ready(channel_selection2(x, indexes))
    ref = x * indexes[None, None, :]
    assert out.shape == (B, N, D)
    assert jnp.allclose(out, ref, atol=1e-6, rtol=1e-6)

    # Donated-input path (input_output_aliases={0: 0}) — safe when the unscaled
    # activation is not reused downstream; reference is computed beforehand.
    x_don = x + 1.0
    ref_don = x_don * indexes[None, None, :]
    donated = jax.jit(
        lambda a, s: channel_selection2(a, s, donate_input=True), donate_argnums=0
    )
    with warnings.catch_warnings():
        warnings.simplefilter("ignore")
        out_don = jax.block_until_ready(donated(x_don, indexes))
    assert jnp.allclose(out_don, ref_don, atol=1e-6, rtol=1e-6)

    # bf16 path exercises the dtype-aware sublane rounding.
    x_bf = x.astype(jnp.bfloat16)
    idx_bf = indexes.astype(jnp.bfloat16)
    out_bf = jax.block_until_ready(channel_selection2(x_bf, idx_bf))
    assert out_bf.dtype == jnp.bfloat16
    assert jnp.allclose(
        out_bf.astype(jnp.float32), (x_bf * idx_bf).astype(jnp.float32),
        atol=1e-2, rtol=1e-2,
    )

    # Narrow-channel packed path: D=32 -> 4 rows folded into one 128-lane row.
    x_small = jax.random.normal(kx2, (2, 8, 32), dtype=jnp.float32)
    idx_small = jnp.ones((32,), jnp.float32) + 0.1 * jax.random.normal(
        ki2, (32,), jnp.float32
    )
    out_small = jax.block_until_ready(channel_selection2(x_small, idx_small))
    assert jnp.allclose(out_small, x_small * idx_small[None, None, :], atol=1e-6, rtol=1e-6)

    # Ragged narrow-channel fallback (row count not divisible by the packing factor).
    x_rag = jax.random.normal(kx3, (2, 9, 32), dtype=jnp.float32)
    out_rag = jax.block_until_ready(channel_selection2(x_rag, idx_small))
    assert jnp.allclose(out_rag, x_rag * idx_small[None, None, :], atol=1e-6, rtol=1e-6)

    # Fused q/k/v-projection + channel selection (the recommended integration).
    w = 0.05 * jax.random.normal(kw, (D, D), dtype=jnp.float32)
    out_fused = jax.block_until_ready(linear_channel_selection(x, w, indexes))
    ref_fused = (
        jnp.einsum("bnk,kf->bnf", x, w, precision=jax.lax.Precision.HIGHEST)
        * indexes[None, None, :]
    )
    assert jnp.allclose(out_fused, ref_fused, atol=5e-2, rtol=5e-2)

    print("KERNEL_OK")
</pallas_src>

<mosaic_0001>
module attributes {stable_mosaic.version = 11 : i64} {
  func.func @_channel_selection_kernel(%arg0: i32, %arg1: memref<130x384xf32, #tpu.memory_space<vmem>>, %arg2: memref<1x384xf32, #tpu.memory_space<vmem>>, %arg3: memref<130x384xf32, #tpu.memory_space<vmem>>) attributes {dimension_semantics = [#tpu.dimension_semantics<parallel>], iteration_bounds = array<i64: 1>, scalar_prefetch = 0 : i64, scratch_operands = 0 : i64, tpu.core_type = #tpu.core_type<tc>, window_params = [{transform_indices = @transform_0, window_bounds = array<i64: 130, 384>}, {pipeline_mode = #tpu.pipeline_mode<synchronous>, transform_indices = @transform_1, window_bounds = array<i64: 1, 384>}, {transform_indices = @transform_2, window_bounds = array<i64: 130, 384>}]} {
    %c0 = arith.constant 0 : index
    %c0_0 = arith.constant 0 : index
    %0 = vector.load %arg1[%c0, %c0_0] : memref<130x384xf32, #tpu.memory_space<vmem>>, vector<130x384xf32>
    %c0_1 = arith.constant 0 : index
    %c0_2 = arith.constant 0 : index
    %1 = vector.load %arg2[%c0_1, %c0_2] : memref<1x384xf32, #tpu.memory_space<vmem>>, vector<1x384xf32>
    %2 = vector.broadcast %1 : vector<1x384xf32> to vector<130x384xf32>
    %3 = arith.mulf %0, %2 : vector<130x384xf32>
    %c0_3 = arith.constant 0 : index
    %c0_4 = arith.constant 0 : index
    %4 = vector.load %arg3[%c0_3, %c0_4] : memref<130x384xf32, #tpu.memory_space<vmem>>, vector<130x384xf32>
    tpu.vector_store %arg3[%c0_3, %c0_4], %3 {strides = array<i32>} : memref<130x384xf32, #tpu.memory_space<vmem>>, vector<130x384xf32>,
    return
  }
  func.func @transform_0(%arg0: i32) -> (i32, i32) {
    %c0_i32 = arith.constant 0 : i32
    %c0_i32_0 = arith.constant 0 : i32
    return %arg0, %c0_i32 : i32, i32
  }
  func.func @transform_1(%arg0: i32) -> (i32, i32) {
    %c0_i32 = arith.constant 0 : i32
    %c0_i32_0 = arith.constant 0 : i32
    %c0_i32_1 = arith.constant 0 : i32
    return %c0_i32, %c0_i32_0 : i32, i32
  }
  func.func @transform_2(%arg0: i32) -> (i32, i32) {
    %c0_i32 = arith.constant 0 : i32
    %c0_i32_0 = arith.constant 0 : i32
    return %arg0, %c0_i32 : i32, i32
  }
}

</mosaic_0001>

<bundles_post_ra>
// kernel: tpu_custom_call.1
= control target key start
LH: loop header
LB: loop body
LE: loop exit
PB: predicated region body
PF: predicated region fallthrough
CT: control target
= control target key end

     0   :  { %7 = vsyncpa [#allocation3], 0  ;;  %s398_s0 = inlined_call_operand.hbm [shape: f32[130,384], index: 0, kind: input, shape index: {}]   ;;  %s399_s1 = inlined_call_operand.hbm [shape: f32[1,384], index: 1, kind: input, shape index: {}]   ;;  %s400_s2 = inlined_call_operand.hbm [shape: f32[130,384], index: 2, kind: output, shape index: {}]  }
   0x1   :  { %8 = vsyncpa [#allocation6], 0 }
   0x2   :  { %9 = vsyncpa [#allocation4], 0  ;;  %s14_s11 = sshll.u32 %s398_s0, 4  ;;  %s306_s12 = smov [#allocation2]   ;;  %s15_s11 = int_to_ptr.hbm [resolvable:$true] %s14_s11 }
   0x3   :  { %s16_s13 = sshll.u32 %s306_s12, 4  ;;  %s28_s16 = sshll.u32 %s399_s1, 4  ;;  %s17_s13 = int_to_ptr.vmem [resolvable:$true] %s16_s13  ;;  %s29_s16 = int_to_ptr.hbm [resolvable:$true] %s28_s16 }
   0x4   :  { %s307_s17 = smov 384   ;;  %s308_s18 = smov 24  }
   0x5   :  { %22 = dma.hbm_to_vmem [thread:$0]  %s15_s11, 6528, %s17_s13, [#allocation3], %s307_s17, %s307_s17, %s308_s18  }
   0x6   :  { %s309_s19 = smov [#allocation5]  }
   0x7   :  { %s30_s20 = sshll.u32 %s309_s19, 4  ;;  %s31_s20 = int_to_ptr.vmem [resolvable:$true] %s30_s20 }
   0x8   :  { %33 = dma.hbm_to_vmem [thread:$0]  %s29_s16, 48, %s31_s20, [#allocation6]  }
   0x9   :  { %300 = dma.done.wait [#allocation3], 6528  }
   0xa   :  { %301 = vsyncadd [#allocation3], 4294960768 }
   0xb   :  { %302 = dma.done.wait [#allocation6], 48  }
   0xc   :  { %303 = vsyncadd [#allocation6], 4294967248  ;;  %v42_v0 = vld [vmem:[#allocation2] sm:$0xff]  ;;  %v93_v1 = vld [vmem:[#allocation5] sm:$0x7]  ;;  %s310_s0 = smov [#allocation7]  }
   0xd   :  { %v43_v2 = vld [vmem:[#allocation2 + $0x8] sm:$0xff]  ;;  %v335_v3 = vperm.slane %v93_v1, 0  ;;  %v337_v4 = vperm.slane %v93_v1, 1  ;;  %v44_v5 = vld [vmem:[#allocation2 + $0x10] sm:$0xff]  ;;  %v339_v6 = vperm.slane %v93_v1, 2  ;;  %v45_v7 = vld [vmem:[#allocation2 + $0x18] sm:$0xff] }
   0xe   :  { %v46_v8 = vld [vmem:[#allocation2 + $0x20] sm:$0xff]  ;;  %v47_v12 = vld [vmem:[#allocation2 + $0x28] sm:$0xff]  ;;  %v48_v14 = vld [vmem:[#allocation2 + $0x30] sm:$0xff]  ;;  %s207_s1 = sshll.u32 %s310_s0, 4  ;;  %s209_s23 = sshll.u32 %s400_s2, 4  ;;  %s208_s1 = int_to_ptr.vmem [resolvable:$true] %s207_s1  ;;  %s210_s23 = int_to_ptr.hbm [resolvable:$true] %s209_s23 }
   0xf   :  { %v101_v9 = vmul.f32 %v335_v3, %v42_v0  ;;  %v102_v10 = vmul.f32 %v337_v4, %v43_v2  ;;  %v103_v11 = vmul.f32 %v339_v6, %v44_v5  ;;  %v104_v13 = vmul.f32 %v335_v3, %v45_v7  ;;  %v49_v16 = vld [vmem:[#allocation2 + $0x38] sm:$0xff]  ;;  %v50_v18 = vld [vmem:[#allocation2 + $0x40] sm:$0xff]  ;;  %v51_v20 = vld [vmem:[#allocation2 + $0x48] sm:$0xff] }
  0x10   :  { %v105_v15 = vmul.f32 %v337_v4, %v46_v8  ;;  %v106_v17 = vmul.f32 %v339_v6, %v47_v12  ;;  %v107_v19 = vmul.f32 %v335_v3, %v48_v14  ;;  %v108_v21 = vmul.f32 %v337_v4, %v49_v16  ;;  %v52_v22 = vld [vmem:[#allocation2 + $0x50] sm:$0xff]  ;;  %v53_v24 = vld [vmem:[#allocation2 + $0x58] sm:$0xff]  ;;  %v54_v26 = vld [vmem:[#allocation2 + $0x60] sm:$0xff] }
  0x11   :  { %152 = vst [vmem:[#allocation7] sm:$0xff] %v101_v9  ;;  %v109_v23 = vmul.f32 %v339_v6, %v50_v18  ;;  %v110_v25 = vmul.f32 %v335_v3, %v51_v20  ;;  %v111_v27 = vmul.f32 %v337_v4, %v52_v22  ;;  %v55_v28 = vld [vmem:[#allocation2 + $0x68] sm:$0xff]  ;;  %v112_v29 = vmul.f32 %v339_v6, %v53_v24  ;;  %v56_v30 = vld [vmem:[#allocation2 + $0x70] sm:$0xff]  ;;  %v57_v32 = vld [vmem:[#allocation2 + $0x78] sm:$0xff] }
  0x12   :  { %153 = vst [vmem:[#allocation7 + $0x8] sm:$0xff] %v102_v10  ;;  %v113_v31 = vmul.f32 %v335_v3, %v54_v26  ;;  %v114_v33 = vmul.f32 %v337_v4, %v55_v28  ;;  %v58_v34 = vld [vmem:[#allocation2 + $0x80] sm:$0xff]  ;;  %v115_v35 = vmul.f32 %v339_v6, %v56_v30  ;;  %v59_v36 = vld [vmem:[#allocation2 + $0x88] sm:$0xff]  ;;  %v116_v37 = vmul.f32 %v335_v3, %v57_v32  ;;  %v60_v38 = vld [vmem:[#allocation2 + $0x90] sm:$0xff] }
  0x13   :  { %154 = vst [vmem:[#allocation7 + $0x10] sm:$0xff] %v103_v11  ;;  %v117_v39 = vmul.f32 %v337_v4, %v58_v34  ;;  %v61_v40 = vld [vmem:[#allocation2 + $0x98] sm:$0xff]  ;;  %v118_v41 = vmul.f32 %v339_v6, %v59_v36  ;;  %v62_v42 = vld [vmem:[#allocation2 + $0xa0] sm:$0xff]  ;;  %v119_v43 = vmul.f32 %v335_v3, %v60_v38  ;;  %v63_v44 = vld [vmem:[#allocation2 + $0xa8] sm:$0xff] }
  0x14   :  { %155 = vst [vmem:[#allocation7 + $0x18] sm:$0xff] %v104_v13  ;;  %v120_v45 = vmul.f32 %v337_v4, %v61_v40  ;;  %v64_v46 = vld [vmem:[#allocation2 + $0xb0] sm:$0xff]  ;;  %v121_v47 = vmul.f32 %v339_v6, %v62_v42  ;;  %v65_v48 = vld [vmem:[#allocation2 + $0xb8] sm:$0xff]  ;;  %v122_v49 = vmul.f32 %v335_v3, %v63_v44  ;;  %v66_v50 = vld [vmem:[#allocation2 + $0xc0] sm:$0xff] }
  0x15   :  { %156 = vst [vmem:[#allocation7 + $0x20] sm:$0xff] %v105_v15  ;;  %v123_v51 = vmul.f32 %v337_v4, %v64_v46  ;;  %v67_v52 = vld [vmem:[#allocation2 + $0xc8] sm:$0xff]  ;;  %v124_v53 = vmul.f32 %v339_v6, %v65_v48  ;;  %v68_v54 = vld [vmem:[#allocation2 + $0xd0] sm:$0xff]  ;;  %v125_v55 = vmul.f32 %v335_v3, %v66_v50  ;;  %v69_v56 = vld [vmem:[#allocation2 + $0xd8] sm:$0xff] }
  0x16   :  { %157 = vst [vmem:[#allocation7 + $0x28] sm:$0xff] %v106_v17  ;;  %v126_v57 = vmul.f32 %v337_v4, %v67_v52  ;;  %v70_v58 = vld [vmem:[#allocation2 + $0xe0] sm:$0xff]  ;;  %v127_v59 = vmul.f32 %v339_v6, %v68_v54  ;;  %v71_v60 = vld [vmem:[#allocation2 + $0xe8] sm:$0xff]  ;;  %v128_v61 = vmul.f32 %v335_v3, %v69_v56  ;;  %v72_v62 = vld [vmem:[#allocation2 + $0xf0] sm:$0xff] }
  0x17   :  { %158 = vst [vmem:[#allocation7 + $0x30] sm:$0xff] %v107_v19  ;;  %v129_v63 = vmul.f32 %v337_v4, %v70_v58  ;;  %v73_v0 = vld [vmem:[#allocation2 + $0xf8] sm:$0xff]  ;;  %v130_v1 = vmul.f32 %v339_v6, %v71_v60  ;;  %v74_v2 = vld [vmem:[#allocation2 + $0x100] sm:$0xff]  ;;  %v131_v5 = vmul.f32 %v335_v3, %v72_v62  ;;  %v75_v7 = vld [vmem:[#allocation2 + $0x108] sm:$0xff] }
  0x18   :  { %159 = vst [vmem:[#allocation7 + $0x38] sm:$0xff] %v108_v21  ;;  %v132_v8 = vmul.f32 %v337_v4, %v73_v0  ;;  %v76_v9 = vld [vmem:[#allocation2 + $0x110] sm:$0xff]  ;;  %v133_v10 = vmul.f32 %v339_v6, %v74_v2  ;;  %v77_v11 = vld [vmem:[#allocation2 + $0x118] sm:$0xff]  ;;  %v134_v12 = vmul.f32 %v335_v3, %v75_v7  ;;  %v78_v13 = vld [vmem:[#allocation2 + $0x120] sm:$0xff] }
  0x19   :  { %160 = vst [vmem:[#allocation7 + $0x40] sm:$0xff] %v109_v23  ;;  %v135_v14 = vmul.f32 %v337_v4, %v76_v9  ;;  %v79_v15 = vld [vmem:[#allocation2 + $0x128] sm:$0xff]  ;;  %v136_v16 = vmul.f32 %v339_v6, %v77_v11  ;;  %v80_v17 = vld [vmem:[#allocation2 + $0x130] sm:$0xff]  ;;  %v137_v18 = vmul.f32 %v335_v3, %v78_v13  ;;  %v81_v19 = vld [vmem:[#allocation2 + $0x138] sm:$0xff] }
  0x1a   :  { %161 = vst [vmem:[#allocation7 + $0x48] sm:$0xff] %v110_v25  ;;  %v138_v20 = vmul.f32 %v337_v4, %v79_v15  ;;  %v82_v21 = vld [vmem:[#allocation2 + $0x140] sm:$0xff]  ;;  %v139_v22 = vmul.f32 %v339_v6, %v80_v17  ;;  %v83_v23 = vld [vmem:[#allocation2 + $0x148] sm:$0xff]  ;;  %v140_v24 = vmul.f32 %v335_v3, %v81_v19  ;;  %v84_v25 = vld [vmem:[#allocation2 + $0x150] sm:$0xff] }
  0x1b   :  { %162 = vst [vmem:[#allocation7 + $0x50] sm:$0xff] %v111_v27  ;;  %v141_v26 = vmul.f32 %v337_v4, %v82_v21  ;;  %v85_v27 = vld [vmem:[#allocation2 + $0x158] sm:$0xff]  ;;  %v142_v28 = vmul.f32 %v339_v6, %v83_v23  ;;  %v143_v30 = vmul.f32 %v335_v3, %v84_v25 }
  0x1c   :  { %163 = vst [vmem:[#allocation7 + $0x58] sm:$0xff] %v112_v29  ;;  %v86_v29 = vld [vmem:[#allocation2 + $0x160] sm:$0xff]  ;;  %v144_v32 = vmul.f32 %v337_v4, %v85_v27 }
  0x1d   :  { %164 = vst [vmem:[#allocation7 + $0x60] sm:$0xff] %v113_v31  ;;  %v87_v31 = vld [vmem:[#allocation2 + $0x168] sm:$0xff]  ;;  %v145_v34 = vmul.f32 %v339_v6, %v86_v29 }
  0x1e   :  { %165 = vst [vmem:[#allocation7 + $0x68] sm:$0xff] %v114_v33  ;;  %v88_v33 = vld [vmem:[#allocation2 + $0x170] sm:$0xff]  ;;  %v146_v36 = vmul.f32 %v335_v3, %v87_v31 }
  0x1f   :  { %166 = vst [vmem:[#allocation7 + $0x70] sm:$0xff] %v115_v35  ;;  %v89_v35 = vld [vmem:[#allocation2 + $0x178] sm:$0xff]  ;;  %v147_v38 = vmul.f32 %v337_v4, %v88_v33 }
  0x20   :  { %167 = vst [vmem:[#allocation7 + $0x78] sm:$0xff] %v116_v37  ;;  %v90_v37 = vld [vmem:[#allocation2 + $0x180] sm:$0x3]  ;;  %v148_v40 = vmul.f32 %v339_v6, %v89_v35 }
  0x21   :  { %168 = vst [vmem:[#allocation7 + $0x80] sm:$0xff] %v117_v39  ;;  %v91_v39 = vld [vmem:[#allocation2 + $0x188] sm:$0x3]  ;;  %v149_v42 = vmul.f32 %v335_v3, %v90_v37 }
  0x22   :  { %169 = vst [vmem:[#allocation7 + $0x88] sm:$0xff] %v118_v41  ;;  %v92_v41 = vld [vmem:[#allocation2 + $0x190] sm:$0x3] }
  0x23   :  { %170 = vst [vmem:[#allocation7 + $0x90] sm:$0xff] %v119_v43  ;;  %v150_v43 = vmul.f32 %v337_v4, %v91_v39  ;;  %v151_v44 = vmul.f32 %v339_v6, %v92_v41 }
  0x24   :  { %171 = vst [vmem:[#allocation7 + $0x98] sm:$0xff] %v120_v45 }
  0x25   :  { %172 = vst [vmem:[#allocation7 + $0xa0] sm:$0xff] %v121_v47 }
  0x26   :  { %173 = vst [vmem:[#allocation7 + $0xa8] sm:$0xff] %v122_v49 }
  0x27   :  { %174 = vst [vmem:[#allocation7 + $0xb0] sm:$0xff] %v123_v51 }
  0x28   :  { %175 = vst [vmem:[#allocation7 + $0xb8] sm:$0xff] %v124_v53 }
  0x29   :  { %176 = vst [vmem:[#allocation7 + $0xc0] sm:$0xff] %v125_v55 }
  0x2a   :  { %177 = vst [vmem:[#allocation7 + $0xc8] sm:$0xff] %v126_v57 }
  0x2b   :  { %178 = vst [vmem:[#allocation7 + $0xd0] sm:$0xff] %v127_v59 }
  0x2c   :  { %179 = vst [vmem:[#allocation7 + $0xd8] sm:$0xff] %v128_v61 }
  0x2d   :  { %180 = vst [vmem:[#allocation7 + $0xe0] sm:$0xff] %v129_v63 }
  0x2e   :  { %181 = vst [vmem:[#allocation7 + $0xe8] sm:$0xff] %v130_v1 }
  0x2f   :  { %182 = vst [vmem:[#allocation7 + $0xf0] sm:$0xff] %v131_v5 }
  0x30   :  { %183 = vst [vmem:[#allocation7 + $0xf8] sm:$0xff] %v132_v8 }
  0x31   :  { %184 = vst [vmem:[#allocation7 + $0x100] sm:$0xff] %v133_v10 }
  0x32   :  { %185 = vst [vmem:[#allocation7 + $0x108] sm:$0xff] %v134_v12 }
  0x33   :  { %186 = vst [vmem:[#allocation7 + $0x110] sm:$0xff] %v135_v14 }
  0x34   :  { %187 = vst [vmem:[#allocation7 + $0x118] sm:$0xff] %v136_v16 }
  0x35   :  { %188 = vst [vmem:[#allocation7 + $0x120] sm:$0xff] %v137_v18 }
  0x36   :  { %189 = vst [vmem:[#allocation7 + $0x128] sm:$0xff] %v138_v20 }
  0x37   :  { %190 = vst [vmem:[#allocation7 + $0x130] sm:$0xff] %v139_v22 }
  0x38   :  { %191 = vst [vmem:[#allocation7 + $0x138] sm:$0xff] %v140_v24 }
  0x39   :  { %192 = vst [vmem:[#allocation7 + $0x140] sm:$0xff] %v141_v26 }
  0x3a   :  { %193 = vst [vmem:[#allocation7 + $0x148] sm:$0xff] %v142_v28 }
  0x3b   :  { %194 = vst [vmem:[#allocation7 + $0x150] sm:$0xff] %v143_v30 }
  0x3c   :  { %195 = vst [vmem:[#allocation7 + $0x158] sm:$0xff] %v144_v32 }
  0x3d   :  { %196 = vst [vmem:[#allocation7 + $0x160] sm:$0xff] %v145_v34 }
  0x3e   :  { %197 = vst [vmem:[#allocation7 + $0x168] sm:$0xff] %v146_v36 }
  0x3f   :  { %198 = vst [vmem:[#allocation7 + $0x170] sm:$0xff] %v147_v38 }
  0x40   :  { %199 = vst [vmem:[#allocation7 + $0x178] sm:$0xff] %v148_v40 }
  0x41   :  { %200 = vst [vmem:[#allocation7 + $0x180] sm:$0x3] %v149_v42 }
  0x42   :  { %201 = vst [vmem:[#allocation7 + $0x188] sm:$0x3] %v150_v43 }
  0x43   :  { %202 = vst [vmem:[#allocation7 + $0x190] sm:$0x3] %v151_v44 }
  0x44   :  { %215 = dma.vmem_to_hbm [thread:$0]  %s208_s1, 6528, %s210_s23, [#allocation4], %s307_s17, %s307_s17, %s308_s18  }
  0x45   :  { %304 = dma.done.wait [#allocation4], 6528  }
  0x46   :  { %305 = vsyncadd [#allocation4], 4294960768 }
  0x47   :  { %220 = vsyncpa [#allocation3], 1 }
  0x48   :  { %221 = vsyncpa [#allocation6], 1 }
  0x49   :  { %222 = vsyncpa [#allocation4], 1 }

</bundles_post_ra>
